<compile_context>
chip_gen: v7x
topology: tpu7x:2x2x1
jax: 0.10.0
libtpu: 0.0.40
codegen_flags: <defaults>
</compile_context>

<pallas_src>
import functools

import jax
import jax.numpy as jnp
from jax.experimental import pallas as pl
from jax.experimental.pallas import tpu as pltpu

BN_EPS = 1e-5
MXU_DTYPE = jnp.bfloat16   # MXU operand dtype (accumulation stays f32)
MXU_ITEMSIZE = 2


def _round_up(x, m):
    return (x + m - 1) // m * m


def _vmem_capacity_bytes():
    try:
        return int(pltpu.get_tpu_info().vmem_capacity_bytes)
    except Exception:
        return 64 * 1024 * 1024  # conservative default = v7x per-TensorCore VMEM


_VMEM_CAP = _vmem_capacity_bytes()
# Scoped limit with headroom for compiler-internal scratch: v7x (64 MiB) -> 48 MiB,
# v5e/v6e (128 MiB) -> 96 MiB.
VMEM_LIMIT = max(16 * 1024 * 1024, min(_VMEM_CAP * 3 // 4, 96 * 1024 * 1024))


def _auto_tile_m(M, Kp, OCp):
    """Largest M tile whose double-buffered footprint fits comfortably in VMEM."""
    budget = VMEM_LIMIT // 2
    fixed = 2 * Kp * OCp * MXU_ITEMSIZE + 4 * 8 * OCp * 4   # resident W + partial-stat blocks
    per_row = 2 * (Kp * MXU_ITEMSIZE + OCp * 4)             # patches-in + Y-out, double-buffered
    tm = (budget - fixed) // per_row
    tm = min(tm, 2048, _round_up(M, 16))
    return int(max((tm // 16) * 16, 16))


def _conv_matmul_stats_kernel(p_ref, w_ref, y_ref, psum_ref, psumsq_ref):
    # p_ref:   [TILE_M, Kp]  bf16 im2col patch tile
    # w_ref:   [Kp, OCp]     bf16 conv weight (grid-invariant block)
    # y_ref:   [TILE_M, OCp] f32 raw conv output (pre-BN), written once per tile
    # psum_ref / psumsq_ref: [8, OCp] f32 per-tile sublane-partial statistics
    acc = jnp.dot(p_ref[...], w_ref[...], preferred_element_type=jnp.float32)
    y_ref[...] = acc
    tm, ocp = acc.shape
    # (8, OCp) slabs map to whole vregs, so the axis-0 sum is plain VPU adds (no XLU reduce
    # per tile); the tiny final cross-sublane reduce happens once in the XLA glue.
    g = acc.reshape(tm // 8, 8, ocp)
    psum_ref[...] = jnp.sum(g, axis=0)
    psumsq_ref[...] = jnp.sum(g * g, axis=0)


def _bn_relu_kernel(y_ref, scale_ref, shift_ref, o_ref):
    # Pure elementwise pass: one FMA + ReLU over the stored raw conv output.
    y = y_ref[...] * scale_ref[...] + shift_ref[...]
    o_ref[...] = jnp.maximum(y, 0.0).astype(o_ref.dtype)


def _im2col(x, kh, kw, stride, padding):
    # x: [N, C, H, W] -> patches [N*OH*OW, C*KH*KW], flattened as (C, kh, kw) to match
    # conv_w.reshape(OC, C*KH*KW).
    N, C, H, W = x.shape
    xp = jnp.pad(x, ((0, 0), (0, 0), (padding, padding), (padding, padding)))
    OH = (H + 2 * padding - kh) // stride + 1
    OW = (W + 2 * padding - kw) // stride + 1
    cols = []
    for i in range(kh):
        for j in range(kw):
            cols.append(xp[:, :, i:i + stride * OH:stride, j:j + stride * OW:stride])
    patches = jnp.stack(cols, axis=0).transpose(1, 3, 4, 2, 0)   # [N, OH, OW, C, KH*KW]
    patches = patches.reshape(N * OH * OW, C * kh * kw)
    return patches, OH, OW


@functools.partial(jax.jit,
                   static_argnames=("stride", "padding", "tile_m", "out_layout"))
def basic_conv2d(x, conv_w, conv_b, bn_gamma, bn_beta, *,
                 stride=1, padding=0, tile_m=None, out_layout="NCHW"):
    """BasicConv2d forward.  x: [N, C, H, W].  Returns NCHW (or NHWC if requested)."""
    N, C, H, W = x.shape
    OC, Cw, KH, KW = conv_w.shape
    assert Cw == C
    out_dtype = x.dtype
    # Train-mode BN subtracts the per-channel batch mean, so a per-channel constant conv
    # bias cancels exactly.  (Would need re-adding for eval-mode / running stats.)
    del conv_b

    # im2col emitted directly in bf16 (halves HBM traffic of the patch materialization).
    patches, OH, OW = _im2col(x.astype(MXU_DTYPE), KH, KW, stride, padding)   # [M, K]
    M, K = patches.shape

    Kp = _round_up(K, 16)          # bf16 sublane pack for the weight's K (sublane) dim
    OCp = _round_up(OC, 128)       # lane-dense output stores / full MXU columns
    # TODO(synk): on v6e/v7x, pad toward 256 for 128 < OC < 256 and fuse sibling small-OC
    # branches to fill the 256-wide MXU columns.
    if tile_m is None:
        tile_m = _auto_tile_m(M, Kp, OCp)
    else:
        tile_m = max(16, min(_round_up(tile_m, 16), _round_up(M, 16)))
    Mp = _round_up(M, tile_m)
    num_tiles = Mp // tile_m

    patches_p = jnp.pad(patches, ((0, Mp - M), (0, Kp - K)))
    w_p = jnp.pad(conv_w.reshape(OC, K).T,
                  ((0, Kp - K), (0, OCp - OC))).astype(MXU_DTYPE)

    # ---- kernel 1: conv matmul (bf16 MXU, f32 acc) + per-tile partial batch statistics ----
    y_raw, psum, psumsq = pl.pallas_call(
        _conv_matmul_stats_kernel,
        out_shape=(
            jax.ShapeDtypeStruct((Mp, OCp), jnp.float32),           # raw conv output Y
            jax.ShapeDtypeStruct((num_tiles * 8, OCp), jnp.float32),  # partial sums
            jax.ShapeDtypeStruct((num_tiles * 8, OCp), jnp.float32),  # partial sum-of-squares
        ),
        grid=(num_tiles,),
        in_specs=[
            pl.BlockSpec((tile_m, Kp), lambda m: (m, 0)),   # patches tile
            pl.BlockSpec((Kp, OCp), lambda m: (0, 0)),      # weight (grid-invariant)
        ],
        out_specs=(
            pl.BlockSpec((tile_m, OCp), lambda m: (m, 0)),
            pl.BlockSpec((8, OCp), lambda m: (m, 0)),
            pl.BlockSpec((8, OCp), lambda m: (m, 0)),
        ),
        compiler_params=pltpu.CompilerParams(
            dimension_semantics=("parallel",),      # no cross-tile state -> v7x can use 2 TCs
            vmem_limit_bytes=VMEM_LIMIT,
        ),
    )(patches_p, w_p)

    # ---- tiny glue: fold partial stats into fused BN scale/shift (train-mode batch stats).
    # Zero-padded rows contribute 0 to both sums, so divide by the true row count M.
    # NOTE: single-pass E[y^2] - E[y]^2 in f32 can cancel for very large M / large means;
    # acceptable at these scales (partial sums are per-tile, final reduce is tiny).
    inv_count = 1.0 / float(M)
    ssum = jnp.sum(psum, axis=0).reshape(1, OCp)
    ssq = jnp.sum(psumsq, axis=0).reshape(1, OCp)
    mean = ssum * inv_count
    var = jnp.maximum(ssq * inv_count - mean * mean, 0.0)
    g_row = jnp.pad(bn_gamma.reshape(1, OC).astype(jnp.float32), ((0, 0), (0, OCp - OC)))
    b_row = jnp.pad(bn_beta.reshape(1, OC).astype(jnp.float32), ((0, 0), (0, OCp - OC)))
    scale_row = g_row * jax.lax.rsqrt(var + BN_EPS)
    shift_row = b_row - mean * scale_row

    # ---- kernel 2: elementwise BN-apply + ReLU, in place over Y when dtypes match ----
    alias = {0: 0} if out_dtype == jnp.float32 else {}
    out_flat = pl.pallas_call(
        _bn_relu_kernel,
        out_shape=jax.ShapeDtypeStruct((Mp, OCp), out_dtype),
        grid=(num_tiles,),
        in_specs=[
            pl.BlockSpec((tile_m, OCp), lambda m: (m, 0)),
            pl.BlockSpec((1, OCp), lambda m: (0, 0)),
            pl.BlockSpec((1, OCp), lambda m: (0, 0)),
        ],
        out_specs=pl.BlockSpec((tile_m, OCp), lambda m: (m, 0)),
        input_output_aliases=alias,
        compiler_params=pltpu.CompilerParams(
            dimension_semantics=("parallel",),
            vmem_limit_bytes=VMEM_LIMIT,
        ),
    )(y_raw, scale_row, shift_row)

    out = out_flat[:M, :OC].reshape(N, OH, OW, OC)       # already channel-last / lane-dense
    if out_layout == "NHWC":
        return out        # skip the NCHW transpose (an extra HBM pass) when chaining layers
    return out.transpose(0, 3, 1, 2)                     # PyTorch-compatible NCHW


def _reference(x, conv_w, conv_b, bn_gamma, bn_beta, stride, padding):
    # Pure-JAX f32 reference (training-mode BN, bias included) for a sanity check.
    y = jax.lax.conv_general_dilated(
        x, conv_w, window_strides=(stride, stride),
        padding=[(padding, padding), (padding, padding)],
        dimension_numbers=("NCHW", "OIHW", "NCHW"))
    y = y + conv_b.reshape(1, -1, 1, 1)
    mu = jnp.mean(y, axis=(0, 2, 3), keepdims=True)
    var = jnp.mean((y - mu) ** 2, axis=(0, 2, 3), keepdims=True)
    yhat = (y - mu) / jnp.sqrt(var + BN_EPS)
    y = yhat * bn_gamma.reshape(1, -1, 1, 1) + bn_beta.reshape(1, -1, 1, 1)
    return jnp.maximum(y, 0.0)


if __name__ == "__main__":
    # BasicConv2d(in_channels=4, out_channels=8, kernel_size=3, stride=1, padding=1)
    N, C, H, W = 2, 4, 16, 16
    OC, KH, KW = 8, 3, 3
    stride, padding = 1, 1

    key = jax.random.PRNGKey(0)
    kx, kw, kb, kg, kbt = jax.random.split(key, 5)
    x = jax.random.normal(kx, (N, C, H, W), dtype=jnp.float32)
    conv_w = 0.1 * jax.random.normal(kw, (OC, C, KH, KW), dtype=jnp.float32)
    conv_b = 0.1 * jax.random.normal(kb, (OC,), dtype=jnp.float32)
    bn_gamma = 1.0 + 0.1 * jax.random.normal(kg, (OC,), dtype=jnp.float32)
    bn_beta = 0.1 * jax.random.normal(kbt, (OC,), dtype=jnp.float32)

    # tile_m=128 -> 4 row tiles: exercises the multi-tile partial-stats reduction path.
    out = basic_conv2d(x, conv_w, conv_b, bn_gamma, bn_beta,
                       stride=stride, padding=padding, tile_m=128)
    out = jax.block_until_ready(out)

    ref = _reference(x, conv_w, conv_b, bn_gamma, bn_beta, stride, padding)
    assert out.shape == (N, OC, H, W), out.shape
    # Tolerance sized for bf16 MXU operands (f32 accumulation) vs the pure-f32 reference.
    err = float(jnp.max(jnp.abs(out - ref)))
    assert err < 5e-2, err

    print("KERNEL_OK")
</pallas_src>

<mosaic_0001>
module attributes {stable_mosaic.version = 11 : i64} {
  func.func @_conv_matmul_stats_kernel(%arg0: i32, %arg1: memref<128x48xbf16, #tpu.memory_space<vmem>>, %arg2: memref<48x128xbf16, #tpu.memory_space<vmem>>, %arg3: memref<128x128xf32, #tpu.memory_space<vmem>>, %arg4: memref<8x128xf32, #tpu.memory_space<vmem>>, %arg5: memref<8x128xf32, #tpu.memory_space<vmem>>) attributes {dimension_semantics = [#tpu.dimension_semantics<parallel>], iteration_bounds = array<i64: 4>, scalar_prefetch = 0 : i64, scratch_operands = 0 : i64, tpu.core_type = #tpu.core_type<tc>, window_params = [{transform_indices = @transform_0, window_bounds = array<i64: 128, 48>}, {pipeline_mode = #tpu.pipeline_mode<synchronous>, transform_indices = @transform_1, window_bounds = array<i64: 48, 128>}, {transform_indices = @transform_2, window_bounds = array<i64: 128, 128>}, {transform_indices = @transform_3, window_bounds = array<i64: 8, 128>}, {transform_indices = @transform_4, window_bounds = array<i64: 8, 128>}]} {
    %c0 = arith.constant 0 : index
    %c0_0 = arith.constant 0 : index
    %0 = vector.load %arg1[%c0, %c0_0] : memref<128x48xbf16, #tpu.memory_space<vmem>>, vector<128x48xbf16>
    %c0_1 = arith.constant 0 : index
    %c0_2 = arith.constant 0 : index
    %1 = vector.load %arg2[%c0_1, %c0_2] : memref<48x128xbf16, #tpu.memory_space<vmem>>, vector<48x128xbf16>
    %cst = arith.constant dense<0.000000e+00> : vector<128x128xf32>
    %2 = tpu.matmul %0, %1, %cst {dimension_numbers = #tpu.dot_dimension_numbers<[1], [0], [0], [1], [0, 0, 1, 1], [], []>} : vector<128x48xbf16>, vector<48x128xbf16>, vector<128x128xf32> -> vector<128x128xf32>
    %c0_3 = arith.constant 0 : index
    %c0_4 = arith.constant 0 : index
    %3 = vector.load %arg3[%c0_3, %c0_4] : memref<128x128xf32, #tpu.memory_space<vmem>>, vector<128x128xf32>
    tpu.vector_store %arg3[%c0_3, %c0_4], %2 {strides = array<i32>} : memref<128x128xf32, #tpu.memory_space<vmem>>, vector<128x128xf32>,
    %4 = vector.shape_cast %2 : vector<128x128xf32> to vector<16x8x128xf32>
    %cst_5 = arith.constant dense<0.000000e+00> : vector<8x128xf32>
    %5 = vector.multi_reduction <add>, %4, %cst_5 [0] : vector<16x8x128xf32> to vector<8x128xf32>
    %c0_6 = arith.constant 0 : index
    %c0_7 = arith.constant 0 : index
    %6 = vector.load %arg4[%c0_6, %c0_7] : memref<8x128xf32, #tpu.memory_space<vmem>>, vector<8x128xf32>
    tpu.vector_store %arg4[%c0_6, %c0_7], %5 {strides = array<i32>} : memref<8x128xf32, #tpu.memory_space<vmem>>, vector<8x128xf32>,
    %7 = arith.mulf %4, %4 : vector<16x8x128xf32>
    %cst_8 = arith.constant dense<0.000000e+00> : vector<8x128xf32>
    %8 = vector.multi_reduction <add>, %7, %cst_8 [0] : vector<16x8x128xf32> to vector<8x128xf32>
    %c0_9 = arith.constant 0 : index
    %c0_10 = arith.constant 0 : index
    %9 = vector.load %arg5[%c0_9, %c0_10] : memref<8x128xf32, #tpu.memory_space<vmem>>, vector<8x128xf32>
    tpu.vector_store %arg5[%c0_9, %c0_10], %8 {strides = array<i32>} : memref<8x128xf32, #tpu.memory_space<vmem>>, vector<8x128xf32>,
    return
  }
  func.func @transform_0(%arg0: i32) -> (i32, i32) {
    %c0_i32 = arith.constant 0 : i32
    %c0_i32_0 = arith.constant 0 : i32
    return %arg0, %c0_i32 : i32, i32
  }
  func.func @transform_1(%arg0: i32) -> (i32, i32) {
    %c0_i32 = arith.constant 0 : i32
    %c0_i32_0 = arith.constant 0 : i32
    %c0_i32_1 = arith.constant 0 : i32
    return %c0_i32, %c0_i32_0 : i32, i32
  }
  func.func @transform_2(%arg0: i32) -> (i32, i32) {
    %c0_i32 = arith.constant 0 : i32
    %c0_i32_0 = arith.constant 0 : i32
    return %arg0, %c0_i32 : i32, i32
  }
  func.func @transform_3(%arg0: i32) -> (i32, i32) {
    %c0_i32 = arith.constant 0 : i32
    %c0_i32_0 = arith.constant 0 : i32
    return %arg0, %c0_i32 : i32, i32
  }
  func.func @transform_4(%arg0: i32) -> (i32, i32) {
    %c0_i32 = arith.constant 0 : i32
    %c0_i32_0 = arith.constant 0 : i32
    return %arg0, %c0_i32 : i32, i32
  }
}

module attributes {stable_mosaic.version = 11 : i64} {
  func.func @_bn_relu_kernel(%arg0: i32, %arg1: memref<128x128xf32, #tpu.memory_space<vmem>>, %arg2: memref<1x128xf32, #tpu.memory_space<vmem>>, %arg3: memref<1x128xf32, #tpu.memory_space<vmem>>, %arg4: memref<128x128xf32, #tpu.memory_space<vmem>>) attributes {dimension_semantics = [#tpu.dimension_semantics<parallel>], iteration_bounds = array<i64: 4>, scalar_prefetch = 0 : i64, scratch_operands = 0 : i64, tpu.core_type = #tpu.core_type<tc>, window_params = [{transform_indices = @transform_0, window_bounds = array<i64: 128, 128>}, {pipeline_mode = #tpu.pipeline_mode<synchronous>, transform_indices = @transform_1, window_bounds = array<i64: 1, 128>}, {pipeline_mode = #tpu.pipeline_mode<synchronous>, transform_indices = @transform_2, window_bounds = array<i64: 1, 128>}, {transform_indices = @transform_3, window_bounds = array<i64: 128, 128>}]} {
    %c0 = arith.constant 0 : index
    %c0_0 = arith.constant 0 : index
    %0 = vector.load %arg1[%c0, %c0_0] : memref<128x128xf32, #tpu.memory_space<vmem>>, vector<128x128xf32>
    %c0_1 = arith.constant 0 : index
    %c0_2 = arith.constant 0 : index
    %1 = vector.load %arg2[%c0_1, %c0_2] : memref<1x128xf32, #tpu.memory_space<vmem>>, vector<1x128xf32>
    %2 = vector.broadcast %1 : vector<1x128xf32> to vector<128x128xf32>
    %3 = arith.mulf %0, %2 : vector<128x128xf32>
    %c0_3 = arith.constant 0 : index
    %c0_4 = arith.constant 0 : index
    %4 = vector.load %arg3[%c0_3, %c0_4] : memref<1x128xf32, #tpu.memory_space<vmem>>, vector<1x128xf32>
    %5 = vector.broadcast %4 : vector<1x128xf32> to vector<128x128xf32>
    %6 = arith.addf %3, %5 : vector<128x128xf32>
    %cst = arith.constant 0.000000e+00 : f32
    %7 = vector.broadcast %cst : f32 to vector<128x128xf32>
    %8 = arith.maximumf %6, %7 : vector<128x128xf32>
    %c0_5 = arith.constant 0 : index
    %c0_6 = arith.constant 0 : index
    %9 = vector.load %arg4[%c0_5, %c0_6] : memref<128x128xf32, #tpu.memory_space<vmem>>, vector<128x128xf32>
    tpu.vector_store %arg4[%c0_5, %c0_6], %8 {strides = array<i32>} : memref<128x128xf32, #tpu.memory_space<vmem>>, vector<128x128xf32>,
    return
  }
  func.func @transform_0(%arg0: i32) -> (i32, i32) {
    %c0_i32 = arith.constant 0 : i32
    %c0_i32_0 = arith.constant 0 : i32
    return %arg0, %c0_i32 : i32, i32
  }
  func.func @transform_1(%arg0: i32) -> (i32, i32) {
    %c0_i32 = arith.constant 0 : i32
    %c0_i32_0 = arith.constant 0 : i32
    %c0_i32_1 = arith.constant 0 : i32
    return %c0_i32, %c0_i32_0 : i32, i32
  }
  func.func @transform_2(%arg0: i32) -> (i32, i32) {
    %c0_i32 = arith.constant 0 : i32
    %c0_i32_0 = arith.constant 0 : i32
    %c0_i32_1 = arith.constant 0 : i32
    return %c0_i32, %c0_i32_0 : i32, i32
  }
  func.func @transform_3(%arg0: i32) -> (i32, i32) {
    %c0_i32 = arith.constant 0 : i32
    %c0_i32_0 = arith.constant 0 : i32
    return %arg0, %c0_i32 : i32, i32
  }
}

</mosaic_0001>

<bundles_post_ra>
// kernel: basic_conv2d.3
= control target key start
LH: loop header
LB: loop body
LE: loop exit
PB: predicated region body
PF: predicated region fallthrough
CT: control target
= control target key end

     0   :  { %s373_s12 = smov 0   ;;  %s439_s0 = inlined_call_operand.vmem [shape: f32[512,128], index: 0, kind: input, shape index: {}, may-alias: {0,3}]   ;;  %s440_s1 = inlined_call_operand.vmem [shape: f32[1,128], index: 1, kind: input, shape index: {}]   ;;  %s441_s2 = inlined_call_operand.vmem [shape: f32[1,128], index: 2, kind: input, shape index: {}]   ;;  %s442_s3 = inlined_call_operand.vmem [shape: f32[512,128], index: 3, kind: output, shape index: {}, may-alias: {0,3}]  }
   0x1 LB: > { %s324_s13 = sadd.s32 4294967295, %s351_s12   ;;  %p328_p0 = scmp.ge.s32.totalorder %s351_s12, 1  ;;  %s351_s12 = sphi %s373_s12, %s13_s12  }
   0x2   : > { %p138_p1 = scmp.lt.s32.totalorder %s351_s12, 5 }
   0x4   : > { %p139_p2 = pnand %p328_p0, %p138_p1 }
   0x5   : > { %s329_s14 = sshll.u32 (!%p139_p2), %s324_s13, 4  ;;  %v333_v0 = vld [vmem:[%s440_s1] ss:$0 sm:$0xff] (!%p139_p2) }
   0x6   : > { %142 = sbr.rel (%p139_p2) target bundleno = 35 (0x23), region = 32  ;;  %p163_p3 = scmp.lt.s32.totalorder (!%p139_p2), %s329_s14, 63  ;;  %v334_v1 = vld [vmem:[%s441_s2] ss:$0 sm:$0xff] (!%p139_p2) }
   0xd   : > { %s444_s14 = smov (!%p163_p3, %s329_s14), 63 }
   0xe   : > { %s330_s15 = sshll.u32 %s444_s14, 3 }
   0xf   : > { %s392_s20 = scalar_lea.vmem %s439_s0, %s330_s15  ;;  %s418_s25 = scalar_lea.vmem %s442_s3, %s330_s15 }
  0x10   : > { %v174_v2 = vld [vmem:[%s392_s20] sm:$0xff]  ;;  %v175_v3 = vld [vmem:[%s392_s20 + $0x8] sm:$0xff]  ;;  %v176_v4 = vld [vmem:[%s392_s20 + $0x10] sm:$0xff] }
  0x11   : > { %v177_v5 = vld [vmem:[%s392_s20 + $0x18] sm:$0xff]  ;;  %v178_v6 = vld [vmem:[%s392_s20 + $0x20] sm:$0xff]  ;;  %v179_v7 = vld [vmem:[%s392_s20 + $0x28] sm:$0xff]  ;;  %v197_v8 = vmul.f32 %v333_v0, %v174_v2  ;;  %v198_v9 = vmul.f32 %v333_v0, %v175_v3  ;;  %v199_v10 = vmul.f32 %v333_v0, %v176_v4 }
  0x12   : > { %v180_v11 = vld [vmem:[%s392_s20 + $0x30] sm:$0xff]  ;;  %v181_v12 = vld [vmem:[%s392_s20 + $0x38] sm:$0xff]  ;;  %v182_v13 = vld [vmem:[%s392_s20 + $0x40] sm:$0xff]  ;;  %v200_v14 = vmul.f32 %v333_v0, %v177_v5  ;;  %v201_v15 = vmul.f32 %v333_v0, %v178_v6  ;;  %v202_v16 = vmul.f32 %v333_v0, %v179_v7 }
  0x13   : > { %v183_v17 = vld [vmem:[%s392_s20 + $0x48] sm:$0xff]  ;;  %v184_v18 = vld [vmem:[%s392_s20 + $0x50] sm:$0xff]  ;;  %v185_v19 = vld [vmem:[%s392_s20 + $0x58] sm:$0xff]  ;;  %v203_v20 = vmul.f32 %v333_v0, %v180_v11  ;;  %v204_v21 = vmul.f32 %v333_v0, %v181_v12  ;;  %v205_v22 = vmul.f32 %v333_v0, %v182_v13  ;;  %v220_v23 = vadd.f32 %v334_v1, %v197_v8 }
  0x14   : > { %v186_v24 = vld [vmem:[%s392_s20 + $0x60] sm:$0xff]  ;;  %v187_v25 = vld [vmem:[%s392_s20 + $0x68] sm:$0xff]  ;;  %v188_v26 = vld [vmem:[%s392_s20 + $0x70] sm:$0xff]  ;;  %v206_v27 = vmul.f32 %v333_v0, %v183_v17  ;;  %v207_v28 = vmul.f32 %v333_v0, %v184_v18  ;;  %v208_v29 = vmul.f32 %v333_v0, %v185_v19  ;;  %v221_v30 = vadd.f32 %v334_v1, %v198_v9 }
  0x15   : > { %v189_v31 = vld [vmem:[%s392_s20 + $0x78] sm:$0xff]  ;;  %v209_v32 = vmul.f32 %v333_v0, %v186_v24  ;;  %v210_v33 = vmul.f32 %v333_v0, %v187_v25  ;;  %v211_v34 = vmul.f32 %v333_v0, %v188_v26  ;;  %v222_v35 = vadd.f32 %v334_v1, %v199_v10 }
  0x16   : > { %v212_v36 = vmul.f32 %v333_v0, %v189_v31  ;;  %v223_v37 = vadd.f32 %v334_v1, %v200_v14  ;;  %v224_v38 = vadd.f32 %v334_v1, %v201_v15  ;;  %v225_v39 = vadd.f32 %v334_v1, %v202_v16 }
  0x17   : > { %v226_v40 = vadd.f32 %v334_v1, %v203_v20  ;;  %v227_v41 = vadd.f32 %v334_v1, %v204_v21  ;;  %v228_v42 = vadd.f32 %v334_v1, %v205_v22  ;;  %v229_v43 = vadd.f32 %v334_v1, %v206_v27 }
  0x18   : > { %v230_v44 = vadd.f32 %v334_v1, %v207_v28  ;;  %v231_v45 = vadd.f32 %v334_v1, %v208_v29  ;;  %v232_v46 = vadd.f32 %v334_v1, %v209_v32  ;;  %v233_v47 = vadd.f32 %v334_v1, %v210_v33 }
  0x19   : > { %v234_v48 = vadd.f32 %v334_v1, %v211_v34  ;;  %v235_v49 = vadd.f32 %v334_v1, %v212_v36  ;;  %v236_v50 = vmax.f32 %v220_v23, 0.0  ;;  %v237_v51 = vmax.f32 %v221_v30, 0.0 }
  0x1a   : > { %v238_v52 = vmax.f32 %v222_v35, 0.0  ;;  %v239_v53 = vmax.f32 %v223_v37, 0.0  ;;  %v240_v54 = vmax.f32 %v224_v38, 0.0  ;;  %v241_v55 = vmax.f32 %v225_v39, 0.0 }
  0x1b   : > { %v242_v56 = vmax.f32 %v226_v40, 0.0  ;;  %v243_v57 = vmax.f32 %v227_v41, 0.0  ;;  %v244_v58 = vmax.f32 %v228_v42, 0.0  ;;  %v245_v59 = vmax.f32 %v229_v43, 0.0  ;;  %252 = vst [vmem:[%s418_s25] sm:$0xff] %v236_v50  ;;  %253 = vst [vmem:[%s418_s25 + $0x8] sm:$0xff] %v237_v51 }
  0x1c   : > { %v246_v60 = vmax.f32 %v230_v44, 0.0  ;;  %v247_v61 = vmax.f32 %v231_v45, 0.0  ;;  %v248_v62 = vmax.f32 %v232_v46, 0.0  ;;  %v249_v63 = vmax.f32 %v233_v47, 0.0  ;;  %254 = vst [vmem:[%s418_s25 + $0x10] sm:$0xff] %v238_v52  ;;  %255 = vst [vmem:[%s418_s25 + $0x18] sm:$0xff] %v239_v53 }
  0x1d   : > { %256 = vst [vmem:[%s418_s25 + $0x20] sm:$0xff] %v240_v54  ;;  %257 = vst [vmem:[%s418_s25 + $0x28] sm:$0xff] %v241_v55  ;;  %v250_v0 = vmax.f32 %v234_v48, 0.0  ;;  %v251_v1 = vmax.f32 %v235_v49, 0.0 }
  0x1e   : > { %258 = vst [vmem:[%s418_s25 + $0x30] sm:$0xff] %v242_v56  ;;  %259 = vst [vmem:[%s418_s25 + $0x38] sm:$0xff] %v243_v57 }
  0x1f   : > { %260 = vst [vmem:[%s418_s25 + $0x40] sm:$0xff] %v244_v58  ;;  %261 = vst [vmem:[%s418_s25 + $0x48] sm:$0xff] %v245_v59 }
  0x20   : > { %262 = vst [vmem:[%s418_s25 + $0x50] sm:$0xff] %v246_v60  ;;  %263 = vst [vmem:[%s418_s25 + $0x58] sm:$0xff] %v247_v61 }
  0x21   : > { %264 = vst [vmem:[%s418_s25 + $0x60] sm:$0xff] %v248_v62  ;;  %265 = vst [vmem:[%s418_s25 + $0x68] sm:$0xff] %v249_v63 }
  0x22   : > { %266 = vst [vmem:[%s418_s25 + $0x70] sm:$0xff] %v250_v0  ;;  %267 = vst [vmem:[%s418_s25 + $0x78] sm:$0xff] %v251_v1 }
  0x23 PF: > { %s13_s12 = sadd.s32 1, %s351_s12  }
  0x24   : > { %p10_p4 = scmp.ge.s32.totalorder %s13_s12, 6  }
  0x26   :  { %12 = sbr.rel (!%p10_p4) target bundleno = 1 (0x1), region = 62 }

// kernel: basic_conv2d.2
= control target key start
LH: loop header
LB: loop body
LE: loop exit
PB: predicated region body
PF: predicated region fallthrough
CT: control target
= control target key end

     0   :  { %s730_s15 = smov 0   ;;  %s797_s0 = inlined_call_operand.vmem [shape: bf16[512,48], index: 0, kind: input, shape index: {}]   ;;  %s798_s1 = inlined_call_operand.vmem [shape: bf16[48,128], index: 1, kind: input, shape index: {}]   ;;  %s799_s2 = inlined_call_operand.vmem [shape: f32[512,128], index: 2, kind: output, shape index: {0}]   ;;  %s800_s3 = inlined_call_operand.vmem [shape: f32[32,128], index: 3, kind: output, shape index: {1}]   ;;  %s801_s4 = inlined_call_operand.vmem [shape: f32[32,128], index: 4, kind: output, shape index: {2}]  }
   0x1 LB: > { %s736_s16 = sadd.s32 4294967295, %s703_s15   ;;  %p611_p0 = scmp.ge.s32.totalorder %s703_s15, 1  ;;  %s703_s15 = sphi %s730_s15, %s15_s15  }
   0x2   : > { %p168_p1 = scmp.lt.s32.totalorder %s703_s15, 5 }
   0x4   : > { %p169_p2 = pnand %p611_p0, %p168_p1 }
   0x5   : > { %v686_v0 = vld [vmem:[%s798_s1] sm:$0xff] (!%p169_p2)   ;;  %s612_s19 = sshll.u32 (!%p169_p2), %s736_s16, 4  ;;  %v687_v1 = vld [vmem:[%s798_s1 + $0x8] sm:$0xff] (!%p169_p2)   ;;  %v688_v2 = vld [vmem:[%s798_s1 + $0x10] sm:$0xff] (!%p169_p2)   ;;  %vm303_vm0 = vcmask (!%p169_p2), 392192   ;;  %p214_p4 = scmp.lt.s32.totalorder (!%p169_p2), %s736_s16, 3 }
   0x6   : > { %172 = sbr.rel (%p169_p2) target bundleno = 266 (0x10a), region = 28  ;;  %p203_p3 = scmp.lt.s32.totalorder (!%p169_p2), %s612_s19, 63  ;;  %650 = vmatprep.subr.bf16.mxu0 (!%p169_p2), %v686_v0  ;;  %672 = vmatprep.subr.bf16.mxu1 (!%p169_p2), %v686_v0 }
   0x7   : > { %651 = vmatpush3.bf16.msra.mxu0 (!%p169_p2), %v686_v0  ;;  %675 = vmatpush3.bf16.msra.mxu1 (!%p169_p2), %v686_v0 }
   0x8   : > { %652 = vmatprep.subr.bf16.mxu0 (!%p169_p2), %v687_v1  ;;  %673 = vmatprep.subr.bf16.mxu1 (!%p169_p2), %v687_v1 }
   0xb   : > { %653 = vmatpush3.bf16.msra.mxu0 (!%p169_p2), %v687_v1  ;;  %676 = vmatpush3.bf16.msra.mxu1 (!%p169_p2), %v687_v1 }
   0xc   : > { %654 = vmatprep.subr.bf16.mxu0 (!%p169_p2), %v688_v2  ;;  %674 = vmatprep.subr.bf16.mxu1 (!%p169_p2), %v688_v2 }
   0xd   : > { %s803_s19 = smov (!%p203_p3, %s612_s19), 63  ;;  %s805_s16 = smov (!%p214_p4, %s736_s16), 3 }
   0xe   : > { %s613_s24 = sshll.u32 %s803_s19, 2  ;;  %s615_s28 = sshll.u32 %s803_s19, 3 }
   0xf   : > { %s206_s27 = scalar_lea.vmem %s797_s0, %s613_s24  ;;  %655 = vmatpush3.bf16.msra.mxu0 %v688_v2  ;;  %677 = vmatpush3.bf16.msra.mxu1 %v688_v2  ;;  %s768_s5 = scalar_lea.vmem %s799_s2, %s615_s28 }
  0x10   : > { %v689_v3 = vld [vmem:[%s206_s27] sm:$0xff]   ;;  %v690_v4 = vld [vmem:[%s206_s27 + $0x8] sm:$0xff]   ;;  %v691_v5 = vld [vmem:[%s206_s27 + $0x10] sm:$0xff]   ;;  %s616_s6 = sshll.u32 %s805_s16, 3 }
  0x11   : > { %656 = vmatprep.mubr.msk.bf16.mxu0 %vm303_vm0, %v689_v3  ;;  %v693_v6 = vld [vmem:[%s206_s27 + $0x20] sm:$0xff]   ;;  %v694_v7 = vld [vmem:[%s206_s27 + $0x28] sm:$0xff]   ;;  %v695_v8 = vld [vmem:[%s206_s27 + $0x30] sm:$0xff]   ;;  %s217_s9 = scalar_lea.vmem %s800_s3, %s616_s6  ;;  %s221_s12 = scalar_lea.vmem %s801_s4, %s616_s6 }
  0x12   : > { %664 = vmatprep.mubr.msk.bf16.mxu1 %vm303_vm0, %v693_v6  ;;  %657 = vmatmul.mubr.msk.bf16.vlgmr.msra.gmra.mrb[0].mxu0 %vm303_vm0, %v690_v4  ;;  %v692_v9 = vld [vmem:[%s206_s27 + $0x18] sm:$0xff]  }
  0x13   : > { %665 = vmatmul.mubr.msk.bf16.vlgmr.msra.gmra.mrb[0].mxu1 %vm303_vm0, %v694_v7  ;;  %660 = vmatprep.mubr.msk.bf16.mxu0 %vm303_vm0, %v691_v5  ;;  %v696_v10 = vld [vmem:[%s206_s27 + $0x38] sm:$0xff]  }
  0x14   : > { %668 = vmatprep.mubr.msk.bf16.mxu1 %vm303_vm0, %v695_v8 }
  0x1a   : > { %661 = vmatmul.mubr.msk.bf16.gmra.mrb[4].mxu0 %vm303_vm0, %v692_v9 }
  0x1b   : > { %669 = vmatmul.mubr.msk.bf16.gmra.mrb[4].mxu1 %vm303_vm0, %v696_v10 }
  0xe5   : > { %v658_v11 = vpop.f32.mrb[0].mxu0 }
  0xe6   : > { %v666_v12 = vpop.f32.mrb[0].mxu1  ;;  %427 = vst [vmem:[%s768_s5 + $0x10] sm:$0xff] %v658_v11  ;;  %v362_v13 = vpop.f32.mrb[1].mxu0  ;;  %v459_v22 = vmul.f32 %v658_v11, %v658_v11 }
  0xe7   : > { %435 = vst [vmem:[%s768_s5 + $0x50] sm:$0xff] %v666_v12  ;;  %v394_v14 = vpop.f32.mrb[1].mxu1  ;;  %425 = vst [vmem:[%s768_s5] sm:$0xff] %v362_v13  ;;  %v659_v15 = vpop.f32.mrb[2].mxu0  ;;  %v457_v19 = vmul.f32 %v362_v13, %v362_v13  ;;  %v467_v54 = vmul.f32 %v666_v12, %v666_v12 }
  0xe8   : > { %433 = vst [vmem:[%s768_s5 + $0x40] sm:$0xff] %v394_v14  ;;  %v667_v16 = vpop.f32.mrb[2].mxu1  ;;  %428 = vst [vmem:[%s768_s5 + $0x18] sm:$0xff] %v659_v15  ;;  %v365_v17 = vpop.f32.mrb[3].mxu0  ;;  %v460_v25 = vmul.f32 %v659_v15, %v659_v15  ;;  %v465_v48 = vmul.f32 %v394_v14, %v394_v14 }
  0xe9   : > { %436 = vst [vmem:[%s768_s5 + $0x58] sm:$0xff] %v667_v16  ;;  %v397_v18 = vpop.f32.mrb[3].mxu1  ;;  %426 = vst [vmem:[%s768_s5 + $0x8] sm:$0xff] %v365_v17  ;;  %v441_v20 = vadd.f32 %v365_v17, %v362_v13  ;;  %v458_v21 = vmul.f32 %v365_v17, %v365_v17  ;;  %v468_v57 = vmul.f32 %v667_v16, %v667_v16 }
  0xea   : > { %434 = vst [vmem:[%s768_s5 + $0x48] sm:$0xff] %v397_v18  ;;  %v466_v53 = vmul.f32 %v397_v18, %v397_v18 }
  0xeb   : > { %v442_v23 = vadd.f32 %v658_v11, %v441_v20  ;;  %v473_v24 = vadd.f32 %v458_v21, %v457_v19 }
  0xed   : > { %v474_v26 = vadd.f32 %v473_v24, %v459_v22  ;;  %v662_v27 = vpop.f32.mrb[4].mxu0  ;;  %v443_v28 = vadd.f32 %v659_v15, %v442_v23 }
  0xee   : > { %v670_v29 = vpop.f32.mrb[4].mxu1  ;;  %431 = vst [vmem:[%s768_s5 + $0x30] sm:$0xff] %v662_v27  ;;  %v378_v30 = vpop.f32.mrb[5].mxu0  ;;  %v463_v42 = vmul.f32 %v662_v27, %v662_v27 }
  0xef   : > { %439 = vst [vmem:[%s768_s5 + $0x70] sm:$0xff] %v670_v29  ;;  %v410_v31 = vpop.f32.mrb[5].mxu1  ;;  %429 = vst [vmem:[%s768_s5 + $0x20] sm:$0xff] %v378_v30  ;;  %v444_v32 = vadd.f32 %v443_v28, %v378_v30  ;;  %v461_v33 = vmul.f32 %v378_v30, %v378_v30  ;;  %v475_v34 = vadd.f32 %v474_v26, %v460_v25  ;;  %v663_v35 = vpop.f32.mrb[6].mxu0 }
  0xf0   : > { %437 = vst [vmem:[%s768_s5 + $0x60] sm:$0xff] %v410_v31  ;;  %v671_v36 = vpop.f32.mrb[6].mxu1  ;;  %432 = vst [vmem:[%s768_s5 + $0x38] sm:$0xff] %v663_v35  ;;  %v381_v37 = vpop.f32.mrb[7].mxu0  ;;  %v464_v45 = vmul.f32 %v663_v35, %v663_v35  ;;  %v469_v60 = vmul.f32 %v410_v31, %v410_v31  ;;  %v471_v2 = vmul.f32 %v670_v29, %v670_v29 }
  0xf1   : > { %440 = vst [vmem:[%s768_s5 + $0x78] sm:$0xff] %v671_v36  ;;  %v413_v38 = vpop.f32.mrb[7].mxu1  ;;  %v476_v39 = vadd.f32 %v475_v34, %v461_v33  ;;  %430 = vst [vmem:[%s768_s5 + $0x28] sm:$0xff] %v381_v37  ;;  %v445_v40 = vadd.f32 %v444_v32, %v381_v37  ;;  %v462_v41 = vmul.f32 %v381_v37, %v381_v37 }
  0xf2   : > { %438 = vst [vmem:[%s768_s5 + $0x68] sm:$0xff] %v413_v38  ;;  %v470_v1 = vmul.f32 %v413_v38, %v413_v38  ;;  %v472_v5 = vmul.f32 %v671_v36, %v671_v36 }
  0xf3   : > { %v446_v43 = vadd.f32 %v662_v27, %v445_v40  ;;  %v477_v44 = vadd.f32 %v476_v39, %v462_v41 }
  0xf5   : > { %v478_v46 = vadd.f32 %v477_v44, %v463_v42  ;;  %v447_v47 = vadd.f32 %v663_v35, %v446_v43 }
  0xf7   : > { %v448_v49 = vadd.f32 %v447_v47, %v394_v14  ;;  %v479_v50 = vadd.f32 %v478_v46, %v464_v45 }
  0xf9   : > { %v480_v51 = vadd.f32 %v479_v50, %v465_v48  ;;  %v449_v52 = vadd.f32 %v448_v49, %v397_v18 }
  0xfb   : > { %v450_v55 = vadd.f32 %v666_v12, %v449_v52  ;;  %v481_v56 = vadd.f32 %v480_v51, %v466_v53 }
  0xfd   : > { %v482_v58 = vadd.f32 %v481_v56, %v467_v54  ;;  %v451_v59 = vadd.f32 %v667_v16, %v450_v55 }
  0xff   : > { %v452_v61 = vadd.f32 %v451_v59, %v410_v31  ;;  %v483_v62 = vadd.f32 %v482_v58, %v468_v57 }
 0x101   : > { %v484_v63 = vadd.f32 %v483_v62, %v469_v60  ;;  %v453_v0 = vadd.f32 %v452_v61, %v413_v38 }
 0x103   : > { %v454_v3 = vadd.f32 %v670_v29, %v453_v0  ;;  %v485_v4 = vadd.f32 %v484_v63, %v470_v1 }
 0x105   : > { %v455_v6 = vadd.f32 %v671_v36, %v454_v3  ;;  %v486_v7 = vadd.f32 %v485_v4, %v471_v2 }
 0x107   : > { %456 = vst [vmem:[%s217_s9] sm:$0xff] %v455_v6  ;;  %v487_v8 = vadd.f32 %v486_v7, %v472_v5 }
 0x109   : > { %488 = vst [vmem:[%s221_s12] sm:$0xff] %v487_v8 }
 0x10a PF: > { %s15_s15 = sadd.s32 1, %s703_s15  }
 0x10b   : > { %p12_p5 = scmp.ge.s32.totalorder %s15_s15, 6  }
 0x10d   :  { %14 = sbr.rel (!%p12_p5) target bundleno = 1 (0x1), region = 82 }

</bundles_post_ra>
